<compile_context>
chip_gen: v5e
topology: v5e:2x2
jax: 0.10.0
libtpu: 0.0.40
codegen_flags: <defaults>
</compile_context>

<pallas_src>
import functools
import math

import jax
import jax.numpy as jnp
from jax.experimental import pallas as pl
from jax.experimental.pallas import tpu as pltpu

_LANE = 128


def _igaussian_kernel(x_ref, o_ref, *, neg_inv_two_sigma_sq):
    # y = 1 - exp(-x^2 / (2 sigma^2)); negation pre-folded into the constant.
    # f32 compute keeps the EUP exp on its native path on every chip.
    x = x_ref[...].astype(jnp.float32)
    t = (x * x) * neg_inv_two_sigma_sq
    # NOTE: -expm1(t) would be more accurate for tiny |x|, but 1-exp matches
    # the PyTorch reference's behaviour and is guaranteed to lower.
    o_ref[...] = (1.0 - jnp.exp(t)).astype(o_ref.dtype)


def _round_up(a: int, b: int) -> int:
    return ((a + b - 1) // b) * b


def _chip_config():
    """Returns (target_block_bytes, tensorcores_per_chip, vmem_limit_bytes|None)."""
    kind = ""
    try:
        kind = jax.devices()[0].device_kind.lower()
    except Exception:
        pass
    if "v7" in kind:
        # 3.2 TB/s HBM, 2 TCs/chip, 64 MiB physical VMEM (32 MiB default scoped):
        # bigger blocks + explicit scoped-VMEM limit to cover double-buffering.
        return 4 << 20, 2, 48 << 20
    # v5e / v6e (and unknown): single TensorCore, 2 MiB is past the roofline knee
    # and stays inside the default scoped-VMEM budget (16 MiB on v5e).
    return 2 << 20, 1, None


def _pick_cols(n: int, sub: int) -> int:
    """Widest lane-dense column count (multiple of 128) that divides n."""
    for cand in (8192, 4096, 2048, 1024, 512, 256):
        if n % cand == 0 and n // cand >= sub:
            return cand
    return _LANE


def _run_slab(slab, *, neg_c, sub, itemsize, target_block_bytes, num_tc, vmem_limit):
    """Run the elementwise kernel over a lane-dense (rows, cols) slab."""
    rows, cols = slab.shape
    max_block_rows = max(sub, (target_block_bytes // (cols * itemsize)) // sub * sub)

    if rows <= max_block_rows:
        block_rows = rows  # whole slab in one block (block == full array dims)
        if (num_tc > 1
                and rows >= num_tc * sub
                and rows * cols * itemsize >= num_tc * (1 << 20)):
            # v7x only: split across both TensorCores, but only when every core
            # still gets a >=1 MiB (full-efficiency) block.
            block_rows = _round_up(pl.cdiv(rows, num_tc), sub)
    else:
        block_rows = max_block_rows
        if num_tc > 1:
            # Best effort: make the grid length a multiple of the TC count so the
            # parallel axis load-balances evenly across both v7x TensorCores.
            g = _round_up(pl.cdiv(rows, block_rows), num_tc)
            block_rows = max(sub, _round_up(pl.cdiv(rows, g), sub))

    grid = (pl.cdiv(rows, block_rows),)

    n_slab = rows * cols
    cost = pl.CostEstimate(
        flops=3 * n_slab,
        transcendentals=n_slab,
        bytes_accessed=2 * n_slab * itemsize,
    )

    kernel = functools.partial(_igaussian_kernel, neg_inv_two_sigma_sq=neg_c)

    return pl.pallas_call(
        kernel,
        out_shape=jax.ShapeDtypeStruct((rows, cols), slab.dtype),
        grid_spec=pltpu.PrefetchScalarGridSpec(
            num_scalar_prefetch=0,
            grid=grid,
            in_specs=[pl.BlockSpec((block_rows, cols), lambda i: (i, 0))],
            out_specs=pl.BlockSpec((block_rows, cols), lambda i: (i, 0)),
        ),
        compiler_params=pltpu.CompilerParams(
            dimension_semantics=("parallel",),
            vmem_limit_bytes=vmem_limit,
        ),
        cost_estimate=cost,
    )(slab)


def igaussian(x: jax.Array, sigma: float = 1.0) -> jax.Array:
    """Inverted-Gaussian activation, elementwise, any floating shape/dtype."""
    orig_shape = x.shape
    orig_dtype = x.dtype
    assert jnp.issubdtype(orig_dtype, jnp.floating), "igaussian expects a float dtype"

    # fp8 (awkward 32-row sublane packing) / f64 (unsupported on TPU): route
    # through f32 and cast back.  Rare path; costs one cast pass.
    if jnp.dtype(orig_dtype) not in (
            jnp.dtype(jnp.float32), jnp.dtype(jnp.bfloat16), jnp.dtype(jnp.float16)):
        return igaussian(x.astype(jnp.float32), sigma).astype(orig_dtype)

    n = math.prod(orig_shape) if orig_shape else 1
    if n == 0:
        return x

    itemsize = jnp.dtype(orig_dtype).itemsize
    sub = 8 if itemsize >= 4 else 16          # sublane multiple (bf16/f16 pack 16)
    neg_c = -1.0 / (2.0 * float(sigma) ** 2)  # negation folded in

    target_block_bytes, num_tc, vmem_limit = _chip_config()
    run = functools.partial(
        _run_slab,
        neg_c=neg_c, sub=sub, itemsize=itemsize,
        target_block_bytes=target_block_bytes, num_tc=num_tc, vmem_limit=vmem_limit,
    )

    # ---- Fast path: element count divisible by 128 -> pure reshape, no copies ----
    if n % _LANE == 0:
        cols = _pick_cols(n, sub)
        out = run(x.reshape(n // cols, cols))
        return out.reshape(orig_shape)

    # ---- Unaligned: kernel on the largest 128-aligned prefix, jnp on the tail ----
    n_prefix = (n // _LANE) * _LANE
    x_flat = x.reshape(-1)
    tail = x_flat[n_prefix:].astype(jnp.float32)
    tail_out = (1.0 - jnp.exp((tail * tail) * neg_c)).astype(orig_dtype)
    if n_prefix == 0:
        # Tensor smaller than one lane row: not worth a pallas_call at all.
        return tail_out.reshape(orig_shape)
    cols = _pick_cols(n_prefix, sub)
    prefix_out = run(x_flat[:n_prefix].reshape(n_prefix // cols, cols)).reshape(-1)
    return jnp.concatenate([prefix_out, tail_out]).reshape(orig_shape)


def igaussian_ref(x: jax.Array, sigma: float = 1.0) -> jax.Array:
    return 1.0 - jnp.exp(-(x * x) / (2.0 * sigma ** 2))


if __name__ == "__main__":
    key = jax.random.PRNGKey(0)
    x = jax.random.normal(key, (2, 4, 16, 16), dtype=jnp.float32)  # NCHW
    sigma = 1.0

    out = jax.block_until_ready(igaussian(x, sigma))
    ref = igaussian_ref(x, sigma)

    assert out.shape == x.shape and out.dtype == x.dtype
    assert jnp.allclose(out, ref, atol=1e-5, rtol=1e-5)

    # Also exercise the unaligned prefix+tail path once (cheap sanity check).
    x2 = jax.random.normal(jax.random.PRNGKey(1), (3, 5, 7), dtype=jnp.float32)
    out2 = jax.block_until_ready(igaussian(x2, 0.7))
    assert jnp.allclose(out2, igaussian_ref(x2, 0.7), atol=1e-5, rtol=1e-5)

    print("KERNEL_OK")
</pallas_src>

<mosaic_0001>
module attributes {stable_mosaic.version = 11 : i64} {
  func.func @_igaussian_kernel(%arg0: i32, %arg1: memref<8x256xf32, #tpu.memory_space<vmem>>, %arg2: memref<8x256xf32, #tpu.memory_space<vmem>>) attributes {dimension_semantics = [#tpu.dimension_semantics<parallel>], iteration_bounds = array<i64: 1>, scalar_prefetch = 0 : i64, scratch_operands = 0 : i64, tpu.core_type = #tpu.core_type<tc>, window_params = [{transform_indices = @transform_0, window_bounds = array<i64: 8, 256>}, {transform_indices = @transform_1, window_bounds = array<i64: 8, 256>}]} {
    %c0 = arith.constant 0 : index
    %c0_0 = arith.constant 0 : index
    %0 = vector.load %arg1[%c0, %c0_0] : memref<8x256xf32, #tpu.memory_space<vmem>>, vector<8x256xf32>
    %1 = arith.mulf %0, %0 : vector<8x256xf32>
    %cst = arith.constant -5.000000e-01 : f32
    %2 = vector.broadcast %cst : f32 to vector<8x256xf32>
    %3 = arith.mulf %1, %2 : vector<8x256xf32>
    %4 = math.exp %3 : vector<8x256xf32>
    %cst_1 = arith.constant 1.000000e+00 : f32
    %5 = vector.broadcast %cst_1 : f32 to vector<8x256xf32>
    %6 = arith.subf %5, %4 : vector<8x256xf32>
    %c0_2 = arith.constant 0 : index
    %c0_3 = arith.constant 0 : index
    %7 = vector.load %arg2[%c0_2, %c0_3] : memref<8x256xf32, #tpu.memory_space<vmem>>, vector<8x256xf32>
    tpu.vector_store %arg2[%c0_2, %c0_3], %6 {strides = array<i32>} : memref<8x256xf32, #tpu.memory_space<vmem>>, vector<8x256xf32>,
    return
  }
  func.func @transform_0(%arg0: i32) -> (i32, i32) {
    %c0_i32 = arith.constant 0 : i32
    %c0_i32_0 = arith.constant 0 : i32
    return %arg0, %c0_i32 : i32, i32
  }
  func.func @transform_1(%arg0: i32) -> (i32, i32) {
    %c0_i32 = arith.constant 0 : i32
    %c0_i32_0 = arith.constant 0 : i32
    return %arg0, %c0_i32 : i32, i32
  }
}

</mosaic_0001>

<bundles_post_ra>
// kernel: tpu_custom_call.1
= control target key start
LH: loop header
LB: loop body
LE: loop exit
PB: predicated region body
PF: predicated region fallthrough
CT: control target
= control target key end

     0   :  { %6 = vsyncpa [#allocation3], 0  ;;  %s130_s0 = inlined_call_operand.hbm [shape: f32[8,256], index: 0, kind: input, shape index: {}]   ;;  %s131_s1 = inlined_call_operand.hbm [shape: f32[8,256], index: 1, kind: output, shape index: {}]  }
   0x1   :  { %7 = vsyncpa [#allocation4], 0  ;;  %s13_s8 = sshll.u32 %s130_s0, 4  ;;  %s112_s9 = smov [#allocation2]   ;;  %s14_s8 = int_to_ptr.hbm [resolvable:$true] %s13_s8 }
   0x2   :  { %s15_s10 = sshll.u32 %s112_s9, 4  ;;  %s16_s10 = int_to_ptr.vmem [resolvable:$true] %s15_s10 }
   0x3   :  { %18 = dma.hbm_to_vmem [thread:$0]  %s14_s8, 256, %s16_s10, [#allocation3]  }
   0x4   :  { %108 = dma.done.wait [#allocation3], 256  }
   0x5   :  { %109 = vsyncadd [#allocation3], 4294967040  ;;  %v23_v0 = vld [vmem:[#allocation2] sm:$0xff]  ;;  %v24_v1 = vld [vmem:[#allocation2 + $0x8] sm:$0xff]  ;;  %s113_s11 = smov [#allocation5]   ;;  %s44_s14 = sshll.u32 %s131_s1, 4  ;;  %s45_s14 = int_to_ptr.hbm [resolvable:$true] %s44_s14 }
   0x6   :  { %v25_v2 = vmul.f32 %v23_v0, %v23_v0  ;;  %v26_v3 = vmul.f32 %v24_v1, %v24_v1  ;;  %s42_s12 = sshll.u32 %s113_s11, 4  ;;  %s43_s12 = int_to_ptr.vmem [resolvable:$true] %s42_s12 }
   0x8   :  { %v27_v4 = vmul.f32 -0.5, %v25_v2  ;;  %v28_v5 = vmul.f32 -0.5, %v26_v3 }
   0xa   :  { %v29_v6 = vmul.f32 1.442695, %v27_v4  ;;  %v31_v7 = vmul.f32 1.442695, %v28_v5 }
   0xc   :  { %56 = vpow2.f32 %v29_v6 }
   0xd   :  { %58 = vpow2.f32 %v31_v7 }
  0x12   :  { %v57_v8 = vpop.eup %56 }
  0x13   :  { %v59_v9 = vpop.eup %58  ;;  %v33_v10 = vsub.f32 1.0, %v57_v8 }
  0x14   :  { %v34_v11 = vsub.f32 1.0, %v59_v9 }
  0x15   :  { %35 = vst [vmem:[#allocation5] sm:$0xff] %v33_v10 }
  0x16   :  { %36 = vst [vmem:[#allocation5 + $0x8] sm:$0xff] %v34_v11 }
  0x17   :  { %47 = dma.vmem_to_hbm [thread:$0]  %s43_s12, 256, %s45_s14, [#allocation4]  }
  0x18   :  { %110 = dma.done.wait [#allocation4], 256  }
  0x19   :  { %111 = vsyncadd [#allocation4], 4294967040 }
  0x1a   :  { %52 = vsyncpa [#allocation3], 1 }
  0x1b   :  { %53 = vsyncpa [#allocation4], 1 }

</bundles_post_ra>
